<compile_context>
chip_gen: v7x
topology: tpu7x:2x2x1
jax: 0.10.0
libtpu: 0.0.40
codegen_flags: <defaults>
</compile_context>

<pallas_src>
import functools

import jax
import jax.numpy as jnp
from jax.experimental import pallas as pl
from jax.experimental.pallas import tpu as pltpu


def _gru_kernel(x_ref, wih_ref, whh_ref, bgi_ref, bhn_ref, wout_ref, bout_ref,
                y_ref, h_out_ref, gi_scratch, hs_scratch, *, seq, batch, hidden):
    """Whole GRU + output Linear in one invocation; time loop runs in-kernel."""
    S, B, H = seq, batch, hidden

    # ---- Hoisted input projection (off the serial chain): one batched MXU matmul.
    gi_scratch[...] = (
        jnp.dot(x_ref[...], wih_ref[...], preferred_element_type=jnp.float32)
        + bgi_ref[...])

    whh = whh_ref[...]          # (H, 3H)
    b_hn = bhn_ref[...]         # (1, H)  -- hidden bias of the n gate only

    def step(t, h_prev):
        off = pl.multiple_of(t * B, B)
        gi_t = gi_scratch[pl.ds(off, B), :]                              # (B, 3H)
        gh = jnp.dot(h_prev, whh, preferred_element_type=jnp.float32)    # (B, 3H)
        r = jax.nn.sigmoid(gi_t[:, 0:H] + gh[:, 0:H])
        z = jax.nn.sigmoid(gi_t[:, H:2 * H] + gh[:, H:2 * H])
        n = jnp.tanh(gi_t[:, 2 * H:] + r * (gh[:, 2 * H:] + b_hn))
        h_new = (1.0 - z) * n + z * h_prev
        hs_scratch[pl.ds(off, B), :] = h_new
        return h_new

    h0 = jnp.zeros((B, H), jnp.float32)
    h_last = jax.lax.fori_loop(0, S, step, h0, unroll=True)

    # Final hidden state written exactly once.
    h_out_ref[...] = h_last.astype(h_out_ref.dtype)

    # ---- Batched output Linear: one (S*B, H) x (H, O) matmul + single store.
    y = (jnp.dot(hs_scratch[...], wout_ref[...],
                 preferred_element_type=jnp.float32) + bout_ref[...])
    y_ref[...] = y.astype(y_ref.dtype)


def gru_model_forward(x_bsi, params):
    """x_bsi: (batch, seq, input) f32 -> (y (batch, seq, out), h (1, batch, hidden))."""
    w_ih, w_hh, b_ih, b_hh, w_out, b_out = (
        params["w_ih"], params["w_hh"], params["b_ih"], params["b_hh"],
        params["w_out"], params["b_out"])

    B, S, I = x_bsi.shape
    H = w_hh.shape[1]
    O = w_out.shape[0]

    # Pad batch to a sublane multiple (8 for f32) for full vreg/MXU-row utilization.
    B_pad = max(8, -(-B // 8) * 8)
    x_sbi = jnp.transpose(x_bsi, (1, 0, 2))                  # time-major (S, B, I)
    if B_pad != B:
        x_sbi = jnp.pad(x_sbi, ((0, 0), (0, B_pad - B), (0, 0)))
    x_flat = x_sbi.reshape(S * B_pad, I)                     # (S*B, I)

    wih_t = jnp.transpose(w_ih)                              # (I, 3H)
    whh_t = jnp.transpose(w_hh)                              # (H, 3H)
    # Fold b_hh of the r/z gates into the hoisted input projection; b_hh_n stays
    # separate because nn.GRU keeps it inside the r*(...) term.
    b_gi = (b_ih + jnp.concatenate(
        [b_hh[:2 * H], jnp.zeros((H,), b_hh.dtype)])).reshape(1, 3 * H)
    b_hn = b_hh[2 * H:].reshape(1, H)
    wout_t = jnp.transpose(w_out)                            # (H, O)
    bout = b_out.reshape(1, O)

    kernel = functools.partial(_gru_kernel, seq=S, batch=B_pad, hidden=H)
    vmem = pl.BlockSpec(memory_space=pltpu.MemorySpace.VMEM)

    y_flat, h_last = pl.pallas_call(
        kernel,
        out_shape=(
            jax.ShapeDtypeStruct((S * B_pad, O), jnp.float32),
            jax.ShapeDtypeStruct((B_pad, H), jnp.float32),
        ),
        in_specs=[vmem] * 7,
        out_specs=(vmem, vmem),
        scratch_shapes=[
            pltpu.VMEM((S * B_pad, 3 * H), jnp.float32),     # hoisted gate inputs
            pltpu.VMEM((S * B_pad, H), jnp.float32),         # per-step hidden states
        ],
    )(x_flat, wih_t, whh_t, b_gi, b_hn, wout_t, bout)

    y_bso = jnp.transpose(y_flat.reshape(S, B_pad, O)[:, :B, :], (1, 0, 2))
    h_out = h_last[:B].reshape(1, B, H)                      # (num_layers*dirs, B, H)
    return y_bso, h_out


def _reference_forward(x_bsi, params):
    """Pure-JAX reference of nn.GRU(batch_first) + Linear, for a sanity check."""
    w_ih, w_hh, b_ih, b_hh, w_out, b_out = (
        params["w_ih"], params["w_hh"], params["b_ih"], params["b_hh"],
        params["w_out"], params["b_out"])
    B, S, I = x_bsi.shape
    H = w_hh.shape[1]

    def step(h, x_t):
        gi = x_t @ w_ih.T + b_ih
        gh = h @ w_hh.T + b_hh
        r = jax.nn.sigmoid(gi[:, :H] + gh[:, :H])
        z = jax.nn.sigmoid(gi[:, H:2 * H] + gh[:, H:2 * H])
        n = jnp.tanh(gi[:, 2 * H:] + r * gh[:, 2 * H:])
        h_new = (1.0 - z) * n + z * h
        return h_new, h_new

    h0 = jnp.zeros((B, H), jnp.float32)
    h_last, hs = jax.lax.scan(step, h0, jnp.transpose(x_bsi, (1, 0, 2)))
    hs = jnp.transpose(hs, (1, 0, 2))                        # (B, S, H)
    y = hs @ w_out.T + b_out
    return y, h_last.reshape(1, B, H)


def init_params(key, input_num, hidden_num, output_num):
    """Deterministic init matching the PyTorch parameter shapes (uniform +-1/sqrt(H))."""
    ks = jax.random.split(key, 6)
    bound = 1.0 / jnp.sqrt(jnp.float32(hidden_num))
    u = lambda k, shape: jax.random.uniform(k, shape, jnp.float32, -bound, bound)
    return {
        "w_ih": u(ks[0], (3 * hidden_num, input_num)),
        "w_hh": u(ks[1], (3 * hidden_num, hidden_num)),
        "b_ih": u(ks[2], (3 * hidden_num,)),
        "b_hh": u(ks[3], (3 * hidden_num,)),
        "w_out": u(ks[4], (output_num, hidden_num)),
        "b_out": u(ks[5], (output_num,)),
    }


if __name__ == "__main__":
    BATCH, SEQ, INPUT_NUM, HIDDEN_NUM, OUTPUT_NUM = 2, 8, 16, 32, 8

    key = jax.random.PRNGKey(0)
    k_x, k_p = jax.random.split(key)
    x = jax.random.normal(k_x, (BATCH, SEQ, INPUT_NUM), jnp.float32)
    params = init_params(k_p, INPUT_NUM, HIDDEN_NUM, OUTPUT_NUM)

    y, h = jax.jit(gru_model_forward)(x, params)
    y = jax.block_until_ready(y)
    h = jax.block_until_ready(h)

    y_ref, h_ref = _reference_forward(x, params)
    assert y.shape == (BATCH, SEQ, OUTPUT_NUM)
    assert h.shape == (1, BATCH, HIDDEN_NUM)
    assert jnp.allclose(y, y_ref, atol=1e-5, rtol=1e-5)
    assert jnp.allclose(h, h_ref, atol=1e-5, rtol=1e-5)

    print("KERNEL_OK")
</pallas_src>

<mosaic_0001>
module attributes {stable_mosaic.version = 11 : i64} {
  func.func @_gru_kernel(%arg0: memref<64x16xf32, #tpu.memory_space<vmem>>, %arg1: memref<16x96xf32, #tpu.memory_space<vmem>>, %arg2: memref<32x96xf32, #tpu.memory_space<vmem>>, %arg3: memref<1x96xf32, #tpu.memory_space<vmem>>, %arg4: memref<1x32xf32, #tpu.memory_space<vmem>>, %arg5: memref<32x8xf32, #tpu.memory_space<vmem>>, %arg6: memref<1x8xf32, #tpu.memory_space<vmem>>, %arg7: memref<64x8xf32, #tpu.memory_space<vmem>>, %arg8: memref<8x32xf32, #tpu.memory_space<vmem>>, %arg9: memref<64x96xf32, #tpu.memory_space<vmem>>, %arg10: memref<64x32xf32, #tpu.memory_space<vmem>>) attributes {dimension_semantics = [], scalar_prefetch = 0 : i64, scratch_operands = 2 : i64, tpu.core_type = #tpu.core_type<tc>} {
    %c0 = arith.constant 0 : index
    %c0_0 = arith.constant 0 : index
    %0 = vector.load %arg0[%c0, %c0_0] : memref<64x16xf32, #tpu.memory_space<vmem>>, vector<64x16xf32>
    %c0_1 = arith.constant 0 : index
    %c0_2 = arith.constant 0 : index
    %1 = vector.load %arg1[%c0_1, %c0_2] : memref<16x96xf32, #tpu.memory_space<vmem>>, vector<16x96xf32>
    %cst = arith.constant dense<0.000000e+00> : vector<64x96xf32>
    %2 = tpu.matmul %0, %1, %cst {dimension_numbers = #tpu.dot_dimension_numbers<[1], [0], [0], [1], [0, 0, 1, 1], [], []>} : vector<64x16xf32>, vector<16x96xf32>, vector<64x96xf32> -> vector<64x96xf32>
    %c0_3 = arith.constant 0 : index
    %c0_4 = arith.constant 0 : index
    %3 = vector.load %arg3[%c0_3, %c0_4] : memref<1x96xf32, #tpu.memory_space<vmem>>, vector<1x96xf32>
    %4 = vector.broadcast %3 : vector<1x96xf32> to vector<64x96xf32>
    %5 = arith.addf %2, %4 : vector<64x96xf32>
    %c0_5 = arith.constant 0 : index
    %c0_6 = arith.constant 0 : index
    %6 = vector.load %arg9[%c0_5, %c0_6] : memref<64x96xf32, #tpu.memory_space<vmem>>, vector<64x96xf32>
    tpu.vector_store %arg9[%c0_5, %c0_6], %5 {strides = array<i32>} : memref<64x96xf32, #tpu.memory_space<vmem>>, vector<64x96xf32>,
    %c0_7 = arith.constant 0 : index
    %c0_8 = arith.constant 0 : index
    %7 = vector.load %arg2[%c0_7, %c0_8] : memref<32x96xf32, #tpu.memory_space<vmem>>, vector<32x96xf32>
    %c0_9 = arith.constant 0 : index
    %c0_10 = arith.constant 0 : index
    %8 = vector.load %arg4[%c0_9, %c0_10] : memref<1x32xf32, #tpu.memory_space<vmem>>, vector<1x32xf32>
    %cst_11 = arith.constant 0.000000e+00 : f32
    %9 = vector.broadcast %cst_11 : f32 to vector<8x32xf32>
    %c0_i32 = arith.constant 0 : i32
    %c8_i32 = arith.constant 8 : i32
    %10 = arith.muli %c0_i32, %c8_i32 : i32
    %11 = tpu.assume_multiple %10, 8 : i32
    %12 = arith.index_cast %11 : i32 to index
    %c0_12 = arith.constant 0 : index
    %13 = vector.load %arg9[%12, %c0_12] : memref<64x96xf32, #tpu.memory_space<vmem>>, vector<8x96xf32>
    %cst_13 = arith.constant dense<0.000000e+00> : vector<8x96xf32>
    %14 = tpu.matmul %9, %7, %cst_13 {dimension_numbers = #tpu.dot_dimension_numbers<[1], [0], [0], [1], [0, 0, 1, 1], [], []>} : vector<8x32xf32>, vector<32x96xf32>, vector<8x96xf32> -> vector<8x96xf32>
    %15 = vector.extract_strided_slice %13 {offsets = [0, 0], sizes = [8, 32], strides = [1, 1]} : vector<8x96xf32> to vector<8x32xf32>
    %16 = vector.extract_strided_slice %14 {offsets = [0, 0], sizes = [8, 32], strides = [1, 1]} : vector<8x96xf32> to vector<8x32xf32>
    %17 = arith.addf %15, %16 : vector<8x32xf32>
    %18 = arith.negf %17 : vector<8x32xf32>
    %19 = math.exp %18 : vector<8x32xf32>
    %cst_14 = arith.constant 1.000000e+00 : f32
    %20 = vector.broadcast %cst_14 : f32 to vector<8x32xf32>
    %21 = arith.addf %20, %19 : vector<8x32xf32>
    %22 = arith.divf %20, %21 : vector<8x32xf32>
    %23 = vector.extract_strided_slice %13 {offsets = [0, 32], sizes = [8, 32], strides = [1, 1]} : vector<8x96xf32> to vector<8x32xf32>
    %24 = vector.extract_strided_slice %14 {offsets = [0, 32], sizes = [8, 32], strides = [1, 1]} : vector<8x96xf32> to vector<8x32xf32>
    %25 = arith.addf %23, %24 : vector<8x32xf32>
    %26 = arith.negf %25 : vector<8x32xf32>
    %27 = math.exp %26 : vector<8x32xf32>
    %cst_15 = arith.constant 1.000000e+00 : f32
    %28 = vector.broadcast %cst_15 : f32 to vector<8x32xf32>
    %29 = arith.addf %28, %27 : vector<8x32xf32>
    %30 = arith.divf %28, %29 : vector<8x32xf32>
    %31 = vector.extract_strided_slice %13 {offsets = [0, 64], sizes = [8, 32], strides = [1, 1]} : vector<8x96xf32> to vector<8x32xf32>
    %32 = vector.extract_strided_slice %14 {offsets = [0, 64], sizes = [8, 32], strides = [1, 1]} : vector<8x96xf32> to vector<8x32xf32>
    %33 = vector.broadcast %8 : vector<1x32xf32> to vector<8x32xf32>
    %34 = arith.addf %32, %33 : vector<8x32xf32>
    %35 = arith.mulf %22, %34 : vector<8x32xf32>
    %36 = arith.addf %31, %35 : vector<8x32xf32>
    %37 = math.tanh %36 : vector<8x32xf32>
    %cst_16 = arith.constant 1.000000e+00 : f32
    %38 = vector.broadcast %cst_16 : f32 to vector<8x32xf32>
    %39 = arith.subf %38, %30 : vector<8x32xf32>
    %40 = arith.mulf %39, %37 : vector<8x32xf32>
    %41 = arith.mulf %30, %9 : vector<8x32xf32>
    %42 = arith.addf %40, %41 : vector<8x32xf32>
    %43 = arith.index_cast %11 : i32 to index
    %c0_17 = arith.constant 0 : index
    %44 = vector.load %arg10[%43, %c0_17] : memref<64x32xf32, #tpu.memory_space<vmem>>, vector<8x32xf32>
    tpu.vector_store %arg10[%43, %c0_17], %42 {strides = array<i32>} : memref<64x32xf32, #tpu.memory_space<vmem>>, vector<8x32xf32>,
    %c1_i32 = arith.constant 1 : i32
    %c8_i32_18 = arith.constant 8 : i32
    %45 = arith.muli %c1_i32, %c8_i32_18 : i32
    %46 = tpu.assume_multiple %45, 8 : i32
    %47 = arith.index_cast %46 : i32 to index
    %c0_19 = arith.constant 0 : index
    %48 = vector.load %arg9[%47, %c0_19] : memref<64x96xf32, #tpu.memory_space<vmem>>, vector<8x96xf32>
    %cst_20 = arith.constant dense<0.000000e+00> : vector<8x96xf32>
    %49 = tpu.matmul %42, %7, %cst_20 {dimension_numbers = #tpu.dot_dimension_numbers<[1], [0], [0], [1], [0, 0, 1, 1], [], []>} : vector<8x32xf32>, vector<32x96xf32>, vector<8x96xf32> -> vector<8x96xf32>
    %50 = vector.extract_strided_slice %48 {offsets = [0, 0], sizes = [8, 32], strides = [1, 1]} : vector<8x96xf32> to vector<8x32xf32>
    %51 = vector.extract_strided_slice %49 {offsets = [0, 0], sizes = [8, 32], strides = [1, 1]} : vector<8x96xf32> to vector<8x32xf32>
    %52 = arith.addf %50, %51 : vector<8x32xf32>
    %53 = arith.negf %52 : vector<8x32xf32>
    %54 = math.exp %53 : vector<8x32xf32>
    %cst_21 = arith.constant 1.000000e+00 : f32
    %55 = vector.broadcast %cst_21 : f32 to vector<8x32xf32>
    %56 = arith.addf %55, %54 : vector<8x32xf32>
    %57 = arith.divf %55, %56 : vector<8x32xf32>
    %58 = vector.extract_strided_slice %48 {offsets = [0, 32], sizes = [8, 32], strides = [1, 1]} : vector<8x96xf32> to vector<8x32xf32>
    %59 = vector.extract_strided_slice %49 {offsets = [0, 32], sizes = [8, 32], strides = [1, 1]} : vector<8x96xf32> to vector<8x32xf32>
    %60 = arith.addf %58, %59 : vector<8x32xf32>
    %61 = arith.negf %60 : vector<8x32xf32>
    %62 = math.exp %61 : vector<8x32xf32>
    %cst_22 = arith.constant 1.000000e+00 : f32
    %63 = vector.broadcast %cst_22 : f32 to vector<8x32xf32>
    %64 = arith.addf %63, %62 : vector<8x32xf32>
    %65 = arith.divf %63, %64 : vector<8x32xf32>
    %66 = vector.extract_strided_slice %48 {offsets = [0, 64], sizes = [8, 32], strides = [1, 1]} : vector<8x96xf32> to vector<8x32xf32>
    %67 = vector.extract_strided_slice %49 {offsets = [0, 64], sizes = [8, 32], strides = [1, 1]} : vector<8x96xf32> to vector<8x32xf32>
    %68 = vector.broadcast %8 : vector<1x32xf32> to vector<8x32xf32>
    %69 = arith.addf %67, %68 : vector<8x32xf32>
    %70 = arith.mulf %57, %69 : vector<8x32xf32>
    %71 = arith.addf %66, %70 : vector<8x32xf32>
    %72 = math.tanh %71 : vector<8x32xf32>
    %cst_23 = arith.constant 1.000000e+00 : f32
    %73 = vector.broadcast %cst_23 : f32 to vector<8x32xf32>
    %74 = arith.subf %73, %65 : vector<8x32xf32>
    %75 = arith.mulf %74, %72 : vector<8x32xf32>
    %76 = arith.mulf %65, %42 : vector<8x32xf32>
    %77 = arith.addf %75, %76 : vector<8x32xf32>
    %78 = arith.index_cast %46 : i32 to index
    %c0_24 = arith.constant 0 : index
    %79 = vector.load %arg10[%78, %c0_24] : memref<64x32xf32, #tpu.memory_space<vmem>>, vector<8x32xf32>
    tpu.vector_store %arg10[%78, %c0_24], %77 {strides = array<i32>} : memref<64x32xf32, #tpu.memory_space<vmem>>, vector<8x32xf32>,
    %c2_i32 = arith.constant 2 : i32
    %c8_i32_25 = arith.constant 8 : i32
    %80 = arith.muli %c2_i32, %c8_i32_25 : i32
    %81 = tpu.assume_multiple %80, 8 : i32
    %82 = arith.index_cast %81 : i32 to index
    %c0_26 = arith.constant 0 : index
    %83 = vector.load %arg9[%82, %c0_26] : memref<64x96xf32, #tpu.memory_space<vmem>>, vector<8x96xf32>
    %cst_27 = arith.constant dense<0.000000e+00> : vector<8x96xf32>
    %84 = tpu.matmul %77, %7, %cst_27 {dimension_numbers = #tpu.dot_dimension_numbers<[1], [0], [0], [1], [0, 0, 1, 1], [], []>} : vector<8x32xf32>, vector<32x96xf32>, vector<8x96xf32> -> vector<8x96xf32>
    %85 = vector.extract_strided_slice %83 {offsets = [0, 0], sizes = [8, 32], strides = [1, 1]} : vector<8x96xf32> to vector<8x32xf32>
    %86 = vector.extract_strided_slice %84 {offsets = [0, 0], sizes = [8, 32], strides = [1, 1]} : vector<8x96xf32> to vector<8x32xf32>
    %87 = arith.addf %85, %86 : vector<8x32xf32>
    %88 = arith.negf %87 : vector<8x32xf32>
    %89 = math.exp %88 : vector<8x32xf32>
    %cst_28 = arith.constant 1.000000e+00 : f32
    %90 = vector.broadcast %cst_28 : f32 to vector<8x32xf32>
    %91 = arith.addf %90, %89 : vector<8x32xf32>
    %92 = arith.divf %90, %91 : vector<8x32xf32>
    %93 = vector.extract_strided_slice %83 {offsets = [0, 32], sizes = [8, 32], strides = [1, 1]} : vector<8x96xf32> to vector<8x32xf32>
    %94 = vector.extract_strided_slice %84 {offsets = [0, 32], sizes = [8, 32], strides = [1, 1]} : vector<8x96xf32> to vector<8x32xf32>
    %95 = arith.addf %93, %94 : vector<8x32xf32>
    %96 = arith.negf %95 : vector<8x32xf32>
    %97 = math.exp %96 : vector<8x32xf32>
    %cst_29 = arith.constant 1.000000e+00 : f32
    %98 = vector.broadcast %cst_29 : f32 to vector<8x32xf32>
    %99 = arith.addf %98, %97 : vector<8x32xf32>
    %100 = arith.divf %98, %99 : vector<8x32xf32>
    %101 = vector.extract_strided_slice %83 {offsets = [0, 64], sizes = [8, 32], strides = [1, 1]} : vector<8x96xf32> to vector<8x32xf32>
    %102 = vector.extract_strided_slice %84 {offsets = [0, 64], sizes = [8, 32], strides = [1, 1]} : vector<8x96xf32> to vector<8x32xf32>
    %103 = vector.broadcast %8 : vector<1x32xf32> to vector<8x32xf32>
    %104 = arith.addf %102, %103 : vector<8x32xf32>
    %105 = arith.mulf %92, %104 : vector<8x32xf32>
    %106 = arith.addf %101, %105 : vector<8x32xf32>
    %107 = math.tanh %106 : vector<8x32xf32>
    %cst_30 = arith.constant 1.000000e+00 : f32
    %108 = vector.broadcast %cst_30 : f32 to vector<8x32xf32>
    %109 = arith.subf %108, %100 : vector<8x32xf32>
    %110 = arith.mulf %109, %107 : vector<8x32xf32>
    %111 = arith.mulf %100, %77 : vector<8x32xf32>
    %112 = arith.addf %110, %111 : vector<8x32xf32>
    %113 = arith.index_cast %81 : i32 to index
    %c0_31 = arith.constant 0 : index
    %114 = vector.load %arg10[%113, %c0_31] : memref<64x32xf32, #tpu.memory_space<vmem>>, vector<8x32xf32>
    tpu.vector_store %arg10[%113, %c0_31], %112 {strides = array<i32>} : memref<64x32xf32, #tpu.memory_space<vmem>>, vector<8x32xf32>,
    %c3_i32 = arith.constant 3 : i32
    %c8_i32_32 = arith.constant 8 : i32
    %115 = arith.muli %c3_i32, %c8_i32_32 : i32
    %116 = tpu.assume_multiple %115, 8 : i32
    %117 = arith.index_cast %116 : i32 to index
    %c0_33 = arith.constant 0 : index
    %118 = vector.load %arg9[%117, %c0_33] : memref<64x96xf32, #tpu.memory_space<vmem>>, vector<8x96xf32>
    %cst_34 = arith.constant dense<0.000000e+00> : vector<8x96xf32>
    %119 = tpu.matmul %112, %7, %cst_34 {dimension_numbers = #tpu.dot_dimension_numbers<[1], [0], [0], [1], [0, 0, 1, 1], [], []>} : vector<8x32xf32>, vector<32x96xf32>, vector<8x96xf32> -> vector<8x96xf32>
    %120 = vector.extract_strided_slice %118 {offsets = [0, 0], sizes = [8, 32], strides = [1, 1]} : vector<8x96xf32> to vector<8x32xf32>
    %121 = vector.extract_strided_slice %119 {offsets = [0, 0], sizes = [8, 32], strides = [1, 1]} : vector<8x96xf32> to vector<8x32xf32>
    %122 = arith.addf %120, %121 : vector<8x32xf32>
    %123 = arith.negf %122 : vector<8x32xf32>
    %124 = math.exp %123 : vector<8x32xf32>
    %cst_35 = arith.constant 1.000000e+00 : f32
    %125 = vector.broadcast %cst_35 : f32 to vector<8x32xf32>
    %126 = arith.addf %125, %124 : vector<8x32xf32>
    %127 = arith.divf %125, %126 : vector<8x32xf32>
    %128 = vector.extract_strided_slice %118 {offsets = [0, 32], sizes = [8, 32], strides = [1, 1]} : vector<8x96xf32> to vector<8x32xf32>
    %129 = vector.extract_strided_slice %119 {offsets = [0, 32], sizes = [8, 32], strides = [1, 1]} : vector<8x96xf32> to vector<8x32xf32>
    %130 = arith.addf %128, %129 : vector<8x32xf32>
    %131 = arith.negf %130 : vector<8x32xf32>
    %132 = math.exp %131 : vector<8x32xf32>
    %cst_36 = arith.constant 1.000000e+00 : f32
    %133 = vector.broadcast %cst_36 : f32 to vector<8x32xf32>
    %134 = arith.addf %133, %132 : vector<8x32xf32>
    %135 = arith.divf %133, %134 : vector<8x32xf32>
    %136 = vector.extract_strided_slice %118 {offsets = [0, 64], sizes = [8, 32], strides = [1, 1]} : vector<8x96xf32> to vector<8x32xf32>
    %137 = vector.extract_strided_slice %119 {offsets = [0, 64], sizes = [8, 32], strides = [1, 1]} : vector<8x96xf32> to vector<8x32xf32>
    %138 = vector.broadcast %8 : vector<1x32xf32> to vector<8x32xf32>
    %139 = arith.addf %137, %138 : vector<8x32xf32>
    %140 = arith.mulf %127, %139 : vector<8x32xf32>
    %141 = arith.addf %136, %140 : vector<8x32xf32>
    %142 = math.tanh %141 : vector<8x32xf32>
    %cst_37 = arith.constant 1.000000e+00 : f32
    %143 = vector.broadcast %cst_37 : f32 to vector<8x32xf32>
    %144 = arith.subf %143, %135 : vector<8x32xf32>
    %145 = arith.mulf %144, %142 : vector<8x32xf32>
    %146 = arith.mulf %135, %112 : vector<8x32xf32>
    %147 = arith.addf %145, %146 : vector<8x32xf32>
    %148 = arith.index_cast %116 : i32 to index
    %c0_38 = arith.constant 0 : index
    %149 = vector.load %arg10[%148, %c0_38] : memref<64x32xf32, #tpu.memory_space<vmem>>, vector<8x32xf32>
    tpu.vector_store %arg10[%148, %c0_38], %147 {strides = array<i32>} : memref<64x32xf32, #tpu.memory_space<vmem>>, vector<8x32xf32>,
    %c4_i32 = arith.constant 4 : i32
    %c8_i32_39 = arith.constant 8 : i32
    %150 = arith.muli %c4_i32, %c8_i32_39 : i32
    %151 = tpu.assume_multiple %150, 8 : i32
    %152 = arith.index_cast %151 : i32 to index
    %c0_40 = arith.constant 0 : index
    %153 = vector.load %arg9[%152, %c0_40] : memref<64x96xf32, #tpu.memory_space<vmem>>, vector<8x96xf32>
    %cst_41 = arith.constant dense<0.000000e+00> : vector<8x96xf32>
    %154 = tpu.matmul %147, %7, %cst_41 {dimension_numbers = #tpu.dot_dimension_numbers<[1], [0], [0], [1], [0, 0, 1, 1], [], []>} : vector<8x32xf32>, vector<32x96xf32>, vector<8x96xf32> -> vector<8x96xf32>
    %155 = vector.extract_strided_slice %153 {offsets = [0, 0], sizes = [8, 32], strides = [1, 1]} : vector<8x96xf32> to vector<8x32xf32>
    %156 = vector.extract_strided_slice %154 {offsets = [0, 0], sizes = [8, 32], strides = [1, 1]} : vector<8x96xf32> to vector<8x32xf32>
    %157 = arith.addf %155, %156 : vector<8x32xf32>
    %158 = arith.negf %157 : vector<8x32xf32>
    %159 = math.exp %158 : vector<8x32xf32>
    %cst_42 = arith.constant 1.000000e+00 : f32
    %160 = vector.broadcast %cst_42 : f32 to vector<8x32xf32>
    %161 = arith.addf %160, %159 : vector<8x32xf32>
    %162 = arith.divf %160, %161 : vector<8x32xf32>
    %163 = vector.extract_strided_slice %153 {offsets = [0, 32], sizes = [8, 32], strides = [1, 1]} : vector<8x96xf32> to vector<8x32xf32>
    %164 = vector.extract_strided_slice %154 {offsets = [0, 32], sizes = [8, 32], strides = [1, 1]} : vector<8x96xf32> to vector<8x32xf32>
    %165 = arith.addf %163, %164 : vector<8x32xf32>
    %166 = arith.negf %165 : vector<8x32xf32>
    %167 = math.exp %166 : vector<8x32xf32>
    %cst_43 = arith.constant 1.000000e+00 : f32
    %168 = vector.broadcast %cst_43 : f32 to vector<8x32xf32>
    %169 = arith.addf %168, %167 : vector<8x32xf32>
    %170 = arith.divf %168, %169 : vector<8x32xf32>
    %171 = vector.extract_strided_slice %153 {offsets = [0, 64], sizes = [8, 32], strides = [1, 1]} : vector<8x96xf32> to vector<8x32xf32>
    %172 = vector.extract_strided_slice %154 {offsets = [0, 64], sizes = [8, 32], strides = [1, 1]} : vector<8x96xf32> to vector<8x32xf32>
    %173 = vector.broadcast %8 : vector<1x32xf32> to vector<8x32xf32>
    %174 = arith.addf %172, %173 : vector<8x32xf32>
    %175 = arith.mulf %162, %174 : vector<8x32xf32>
    %176 = arith.addf %171, %175 : vector<8x32xf32>
    %177 = math.tanh %176 : vector<8x32xf32>
    %cst_44 = arith.constant 1.000000e+00 : f32
    %178 = vector.broadcast %cst_44 : f32 to vector<8x32xf32>
    %179 = arith.subf %178, %170 : vector<8x32xf32>
    %180 = arith.mulf %179, %177 : vector<8x32xf32>
    %181 = arith.mulf %170, %147 : vector<8x32xf32>
    %182 = arith.addf %180, %181 : vector<8x32xf32>
    %183 = arith.index_cast %151 : i32 to index
    %c0_45 = arith.constant 0 : index
    %184 = vector.load %arg10[%183, %c0_45] : memref<64x32xf32, #tpu.memory_space<vmem>>, vector<8x32xf32>
    tpu.vector_store %arg10[%183, %c0_45], %182 {strides = array<i32>} : memref<64x32xf32, #tpu.memory_space<vmem>>, vector<8x32xf32>,
    %c5_i32 = arith.constant 5 : i32
    %c8_i32_46 = arith.constant 8 : i32
    %185 = arith.muli %c5_i32, %c8_i32_46 : i32
    %186 = tpu.assume_multiple %185, 8 : i32
    %187 = arith.index_cast %186 : i32 to index
    %c0_47 = arith.constant 0 : index
    %188 = vector.load %arg9[%187, %c0_47] : memref<64x96xf32, #tpu.memory_space<vmem>>, vector<8x96xf32>
    %cst_48 = arith.constant dense<0.000000e+00> : vector<8x96xf32>
    %189 = tpu.matmul %182, %7, %cst_48 {dimension_numbers = #tpu.dot_dimension_numbers<[1], [0], [0], [1], [0, 0, 1, 1], [], []>} : vector<8x32xf32>, vector<32x96xf32>, vector<8x96xf32> -> vector<8x96xf32>
    %190 = vector.extract_strided_slice %188 {offsets = [0, 0], sizes = [8, 32], strides = [1, 1]} : vector<8x96xf32> to vector<8x32xf32>
    %191 = vector.extract_strided_slice %189 {offsets = [0, 0], sizes = [8, 32], strides = [1, 1]} : vector<8x96xf32> to vector<8x32xf32>
    %192 = arith.addf %190, %191 : vector<8x32xf32>
    %193 = arith.negf %192 : vector<8x32xf32>
    %194 = math.exp %193 : vector<8x32xf32>
    %cst_49 = arith.constant 1.000000e+00 : f32
    %195 = vector.broadcast %cst_49 : f32 to vector<8x32xf32>
    %196 = arith.addf %195, %194 : vector<8x32xf32>
    %197 = arith.divf %195, %196 : vector<8x32xf32>
    %198 = vector.extract_strided_slice %188 {offsets = [0, 32], sizes = [8, 32], strides = [1, 1]} : vector<8x96xf32> to vector<8x32xf32>
    %199 = vector.extract_strided_slice %189 {offsets = [0, 32], sizes = [8, 32], strides = [1, 1]} : vector<8x96xf32> to vector<8x32xf32>
    %200 = arith.addf %198, %199 : vector<8x32xf32>
    %201 = arith.negf %200 : vector<8x32xf32>
    %202 = math.exp %201 : vector<8x32xf32>
    %cst_50 = arith.constant 1.000000e+00 : f32
    %203 = vector.broadcast %cst_50 : f32 to vector<8x32xf32>
    %204 = arith.addf %203, %202 : vector<8x32xf32>
    %205 = arith.divf %203, %204 : vector<8x32xf32>
    %206 = vector.extract_strided_slice %188 {offsets = [0, 64], sizes = [8, 32], strides = [1, 1]} : vector<8x96xf32> to vector<8x32xf32>
    %207 = vector.extract_strided_slice %189 {offsets = [0, 64], sizes = [8, 32], strides = [1, 1]} : vector<8x96xf32> to vector<8x32xf32>
    %208 = vector.broadcast %8 : vector<1x32xf32> to vector<8x32xf32>
    %209 = arith.addf %207, %208 : vector<8x32xf32>
    %210 = arith.mulf %197, %209 : vector<8x32xf32>
    %211 = arith.addf %206, %210 : vector<8x32xf32>
    %212 = math.tanh %211 : vector<8x32xf32>
    %cst_51 = arith.constant 1.000000e+00 : f32
    %213 = vector.broadcast %cst_51 : f32 to vector<8x32xf32>
    %214 = arith.subf %213, %205 : vector<8x32xf32>
    %215 = arith.mulf %214, %212 : vector<8x32xf32>
    %216 = arith.mulf %205, %182 : vector<8x32xf32>
    %217 = arith.addf %215, %216 : vector<8x32xf32>
    %218 = arith.index_cast %186 : i32 to index
    %c0_52 = arith.constant 0 : index
    %219 = vector.load %arg10[%218, %c0_52] : memref<64x32xf32, #tpu.memory_space<vmem>>, vector<8x32xf32>
    tpu.vector_store %arg10[%218, %c0_52], %217 {strides = array<i32>} : memref<64x32xf32, #tpu.memory_space<vmem>>, vector<8x32xf32>,
    %c6_i32 = arith.constant 6 : i32
    %c8_i32_53 = arith.constant 8 : i32
    %220 = arith.muli %c6_i32, %c8_i32_53 : i32
    %221 = tpu.assume_multiple %220, 8 : i32
    %222 = arith.index_cast %221 : i32 to index
    %c0_54 = arith.constant 0 : index
    %223 = vector.load %arg9[%222, %c0_54] : memref<64x96xf32, #tpu.memory_space<vmem>>, vector<8x96xf32>
    %cst_55 = arith.constant dense<0.000000e+00> : vector<8x96xf32>
    %224 = tpu.matmul %217, %7, %cst_55 {dimension_numbers = #tpu.dot_dimension_numbers<[1], [0], [0], [1], [0, 0, 1, 1], [], []>} : vector<8x32xf32>, vector<32x96xf32>, vector<8x96xf32> -> vector<8x96xf32>
    %225 = vector.extract_strided_slice %223 {offsets = [0, 0], sizes = [8, 32], strides = [1, 1]} : vector<8x96xf32> to vector<8x32xf32>
    %226 = vector.extract_strided_slice %224 {offsets = [0, 0], sizes = [8, 32], strides = [1, 1]} : vector<8x96xf32> to vector<8x32xf32>
    %227 = arith.addf %225, %226 : vector<8x32xf32>
    %228 = arith.negf %227 : vector<8x32xf32>
    %229 = math.exp %228 : vector<8x32xf32>
    %cst_56 = arith.constant 1.000000e+00 : f32
    %230 = vector.broadcast %cst_56 : f32 to vector<8x32xf32>
    %231 = arith.addf %230, %229 : vector<8x32xf32>
    %232 = arith.divf %230, %231 : vector<8x32xf32>
    %233 = vector.extract_strided_slice %223 {offsets = [0, 32], sizes = [8, 32], strides = [1, 1]} : vector<8x96xf32> to vector<8x32xf32>
    %234 = vector.extract_strided_slice %224 {offsets = [0, 32], sizes = [8, 32], strides = [1, 1]} : vector<8x96xf32> to vector<8x32xf32>
    %235 = arith.addf %233, %234 : vector<8x32xf32>
    %236 = arith.negf %235 : vector<8x32xf32>
    %237 = math.exp %236 : vector<8x32xf32>
    %cst_57 = arith.constant 1.000000e+00 : f32
    %238 = vector.broadcast %cst_57 : f32 to vector<8x32xf32>
    %239 = arith.addf %238, %237 : vector<8x32xf32>
    %240 = arith.divf %238, %239 : vector<8x32xf32>
    %241 = vector.extract_strided_slice %223 {offsets = [0, 64], sizes = [8, 32], strides = [1, 1]} : vector<8x96xf32> to vector<8x32xf32>
    %242 = vector.extract_strided_slice %224 {offsets = [0, 64], sizes = [8, 32], strides = [1, 1]} : vector<8x96xf32> to vector<8x32xf32>
    %243 = vector.broadcast %8 : vector<1x32xf32> to vector<8x32xf32>
    %244 = arith.addf %242, %243 : vector<8x32xf32>
    %245 = arith.mulf %232, %244 : vector<8x32xf32>
    %246 = arith.addf %241, %245 : vector<8x32xf32>
    %247 = math.tanh %246 : vector<8x32xf32>
    %cst_58 = arith.constant 1.000000e+00 : f32
    %248 = vector.broadcast %cst_58 : f32 to vector<8x32xf32>
    %249 = arith.subf %248, %240 : vector<8x32xf32>
    %250 = arith.mulf %249, %247 : vector<8x32xf32>
    %251 = arith.mulf %240, %217 : vector<8x32xf32>
    %252 = arith.addf %250, %251 : vector<8x32xf32>
    %253 = arith.index_cast %221 : i32 to index
    %c0_59 = arith.constant 0 : index
    %254 = vector.load %arg10[%253, %c0_59] : memref<64x32xf32, #tpu.memory_space<vmem>>, vector<8x32xf32>
    tpu.vector_store %arg10[%253, %c0_59], %252 {strides = array<i32>} : memref<64x32xf32, #tpu.memory_space<vmem>>, vector<8x32xf32>,
    %c7_i32 = arith.constant 7 : i32
    %c8_i32_60 = arith.constant 8 : i32
    %255 = arith.muli %c7_i32, %c8_i32_60 : i32
    %256 = tpu.assume_multiple %255, 8 : i32
    %257 = arith.index_cast %256 : i32 to index
    %c0_61 = arith.constant 0 : index
    %258 = vector.load %arg9[%257, %c0_61] : memref<64x96xf32, #tpu.memory_space<vmem>>, vector<8x96xf32>
    %cst_62 = arith.constant dense<0.000000e+00> : vector<8x96xf32>
    %259 = tpu.matmul %252, %7, %cst_62 {dimension_numbers = #tpu.dot_dimension_numbers<[1], [0], [0], [1], [0, 0, 1, 1], [], []>} : vector<8x32xf32>, vector<32x96xf32>, vector<8x96xf32> -> vector<8x96xf32>
    %260 = vector.extract_strided_slice %258 {offsets = [0, 0], sizes = [8, 32], strides = [1, 1]} : vector<8x96xf32> to vector<8x32xf32>
    %261 = vector.extract_strided_slice %259 {offsets = [0, 0], sizes = [8, 32], strides = [1, 1]} : vector<8x96xf32> to vector<8x32xf32>
    %262 = arith.addf %260, %261 : vector<8x32xf32>
    %263 = arith.negf %262 : vector<8x32xf32>
    %264 = math.exp %263 : vector<8x32xf32>
    %cst_63 = arith.constant 1.000000e+00 : f32
    %265 = vector.broadcast %cst_63 : f32 to vector<8x32xf32>
    %266 = arith.addf %265, %264 : vector<8x32xf32>
    %267 = arith.divf %265, %266 : vector<8x32xf32>
    %268 = vector.extract_strided_slice %258 {offsets = [0, 32], sizes = [8, 32], strides = [1, 1]} : vector<8x96xf32> to vector<8x32xf32>
    %269 = vector.extract_strided_slice %259 {offsets = [0, 32], sizes = [8, 32], strides = [1, 1]} : vector<8x96xf32> to vector<8x32xf32>
    %270 = arith.addf %268, %269 : vector<8x32xf32>
    %271 = arith.negf %270 : vector<8x32xf32>
    %272 = math.exp %271 : vector<8x32xf32>
    %cst_64 = arith.constant 1.000000e+00 : f32
    %273 = vector.broadcast %cst_64 : f32 to vector<8x32xf32>
    %274 = arith.addf %273, %272 : vector<8x32xf32>
    %275 = arith.divf %273, %274 : vector<8x32xf32>
    %276 = vector.extract_strided_slice %258 {offsets = [0, 64], sizes = [8, 32], strides = [1, 1]} : vector<8x96xf32> to vector<8x32xf32>
    %277 = vector.extract_strided_slice %259 {offsets = [0, 64], sizes = [8, 32], strides = [1, 1]} : vector<8x96xf32> to vector<8x32xf32>
    %278 = vector.broadcast %8 : vector<1x32xf32> to vector<8x32xf32>
    %279 = arith.addf %277, %278 : vector<8x32xf32>
    %280 = arith.mulf %267, %279 : vector<8x32xf32>
    %281 = arith.addf %276, %280 : vector<8x32xf32>
    %282 = math.tanh %281 : vector<8x32xf32>
    %cst_65 = arith.constant 1.000000e+00 : f32
    %283 = vector.broadcast %cst_65 : f32 to vector<8x32xf32>
    %284 = arith.subf %283, %275 : vector<8x32xf32>
    %285 = arith.mulf %284, %282 : vector<8x32xf32>
    %286 = arith.mulf %275, %252 : vector<8x32xf32>
    %287 = arith.addf %285, %286 : vector<8x32xf32>
    %288 = arith.index_cast %256 : i32 to index
    %c0_66 = arith.constant 0 : index
    %289 = vector.load %arg10[%288, %c0_66] : memref<64x32xf32, #tpu.memory_space<vmem>>, vector<8x32xf32>
    tpu.vector_store %arg10[%288, %c0_66], %287 {strides = array<i32>} : memref<64x32xf32, #tpu.memory_space<vmem>>, vector<8x32xf32>,
    %c8_i32_67 = arith.constant 8 : i32
    %c0_68 = arith.constant 0 : index
    %c0_69 = arith.constant 0 : index
    %290 = vector.load %arg8[%c0_68, %c0_69] : memref<8x32xf32, #tpu.memory_space<vmem>>, vector<8x32xf32>
    tpu.vector_store %arg8[%c0_68, %c0_69], %287 {strides = array<i32>} : memref<8x32xf32, #tpu.memory_space<vmem>>, vector<8x32xf32>,
    %c0_70 = arith.constant 0 : index
    %c0_71 = arith.constant 0 : index
    %291 = vector.load %arg10[%c0_70, %c0_71] : memref<64x32xf32, #tpu.memory_space<vmem>>, vector<64x32xf32>
    %c0_72 = arith.constant 0 : index
    %c0_73 = arith.constant 0 : index
    %292 = vector.load %arg5[%c0_72, %c0_73] : memref<32x8xf32, #tpu.memory_space<vmem>>, vector<32x8xf32>
    %cst_74 = arith.constant dense<0.000000e+00> : vector<64x8xf32>
    %293 = tpu.matmul %291, %292, %cst_74 {dimension_numbers = #tpu.dot_dimension_numbers<[1], [0], [0], [1], [0, 0, 1, 1], [], []>} : vector<64x32xf32>, vector<32x8xf32>, vector<64x8xf32> -> vector<64x8xf32>
    %c0_75 = arith.constant 0 : index
    %c0_76 = arith.constant 0 : index
    %294 = vector.load %arg6[%c0_75, %c0_76] : memref<1x8xf32, #tpu.memory_space<vmem>>, vector<1x8xf32>
    %295 = vector.broadcast %294 : vector<1x8xf32> to vector<64x8xf32>
    %296 = arith.addf %293, %295 : vector<64x8xf32>
    %c0_77 = arith.constant 0 : index
    %c0_78 = arith.constant 0 : index
    %297 = vector.load %arg7[%c0_77, %c0_78] : memref<64x8xf32, #tpu.memory_space<vmem>>, vector<64x8xf32>
    tpu.vector_store %arg7[%c0_77, %c0_78], %296 {strides = array<i32>} : memref<64x8xf32, #tpu.memory_space<vmem>>, vector<64x8xf32>,
    return
  }
}

</mosaic_0001>

<bundles_post_ra>
// kernel: gru_model_forward.1
= control target key start
LH: loop header
LB: loop body
LE: loop exit
PB: predicated region body
PF: predicated region fallthrough
CT: control target
= control target key end

     0   :  { %vm45_vm0 = vcmask 130048   ;;  %v1554_v11 = vmov 0.0|0.0   ;;  %s1555_s28 = smov 64   ;;  %vm1556_vm1 = vmmov 0   ;;  %v1557_v17 = vmov 0.0   ;;  %s1862_s1 = inlined_call_operand.vmem [shape: f32[16,96], index: 1, kind: input, shape index: {}]   ;;  %s1863_s0 = inlined_call_operand.vmem [shape: f32[64,16], index: 0, kind: input, shape index: {}]   ;;  %s1864_s2 = inlined_call_operand.vmem [shape: f32[32,96], index: 2, kind: input, shape index: {}]   ;;  %s1865_s4 = inlined_call_operand.vmem [shape: f32[1,32], index: 4, kind: input, shape index: {}]   ;;  %s1866_s3 = inlined_call_operand.vmem [shape: f32[1,96], index: 3, kind: input, shape index: {}]   ;;  %s1867_s5 = inlined_call_operand.vmem [shape: f32[32,8], index: 5, kind: input, shape index: {}]   ;;  %s1868_s6 = inlined_call_operand.vmem [shape: f32[1,8], index: 6, kind: input, shape index: {}]   ;;  %s1869_s7 = inlined_call_operand.vmem [shape: f32[64,8], index: 7, kind: output, shape index: {0}]   ;;  %s1870_s8 = inlined_call_operand.vmem [shape: f32[8,32], index: 8, kind: output, shape index: {1}]  }
   0x1   :  { %v36_v0 = vld [vmem:[%s1862_s1] sm:$0xff]  ;;  %v37_v1 = vld [vmem:[%s1862_s1 + $0x8] sm:$0xff]  ;;  %v34_v12 = vld [vmem:[%s1863_s0 + $0x30] sm:$0xff]  ;;  %vm175_vm2 = vcmask 785408   ;;  %vm190_vm3 = vcmask 261120   ;;  %vm1202_vm4 = vcmask 64512  }
   0x2   :  { %v28_v2 = vld [vmem:[%s1863_s0] sm:$0xff]  ;;  %v1439_v3 = vpack.c.bf16 %v37_v1, %v36_v0  ;;  %v185_v6 = vld [vmem:[%s1864_s2 + $0x8] sm:$0xff]  ;;  %v186_v13 = vld [vmem:[%s1864_s2 + $0x10] sm:$0xff] }
   0x3   :  { %1319 = vmatprep.mubr.msk.f32.mxu0 %vm45_vm0, %v28_v2  ;;  %v32_v4 = vld [vmem:[%s1863_s0 + $0x20] sm:$0xff]  ;;  %v29_v7 = vld [vmem:[%s1863_s0 + $0x8] sm:$0xff]  ;;  %v187_v14 = vld [vmem:[%s1864_s2 + $0x18] sm:$0xff] }
   0x4   :  { %1325 = vmatprep.mubr.msk.f32.mxu1 %vm45_vm0, %v32_v4  ;;  %v184_v5 = vld [vmem:[%s1864_s2] sm:$0xff]  ;;  %1440 = vmatprep.subr.bf16.mxu0 %v1439_v3  ;;  %v33_v8 = vld [vmem:[%s1863_s0 + $0x28] sm:$0xff]  ;;  %v35_v15 = vld [vmem:[%s1863_s0 + $0x38] sm:$0xff]  ;;  %v1654_v16 = vpack.c.bf16 %v187_v14, %v186_v13 }
   0x5   :  { %1499 = vmatprep.subr.bf16.mxu1 %v1439_v3  ;;  %1442 = vmatpush3.bf16.msra.mxu0 %v1439_v3  ;;  %v1630_v9 = vpack.c.bf16 %v185_v6, %v184_v5  ;;  %v1229_v10 = vld [vmem:[%s1865_s4] ss:$0 sm:$0xff]  ;;  %v30_v1 = vld [vmem:[%s1863_s0 + $0x10] sm:$0xff]  ;;  %v31_v2 = vld [vmem:[%s1863_s0 + $0x18] sm:$0xff] }
   0x6   :  { %1500 = vmatpush3.bf16.msra.mxu1 %v1439_v3  ;;  %276 = vrot.lane.b32.xlu0 %v1229_v10, %s1555_s28  ;;  %v1676_v18 = vld [vmem:[%s1866_s3] ss:$0 sm:$0xff]  ;;  %s1558_s3 = smov 96  }
   0x7   :  { %1443 = vmatprep.subr.bf16.mxu1 %v1554_v11  ;;  %1455 = vmatprep.subr.bf16.mxu0 %v1554_v11 }
   0x8   :  { %1320 = vmatmul.mubr.msk.f32.vlgmr.msra.gmra.mrb[0].mxu0 %vm45_vm0, %v29_v7 }
   0x9   :  { %1326 = vmatmul.mubr.msk.f32.vlgmr.msra.gmra.mrb[0].mxu1 %vm45_vm0, %v33_v8  ;;  %1457 = vmatpush3.bf16.msra.mxu0 %v1630_v9 }
   0xa   :  { %1445 = vmatpush3.bf16.msra.mxu1 %v1630_v9  ;;  %1328 = vmatprep.mubr.msk.f32.mxu1 %vm45_vm0, %v34_v12 }
   0xb   :  { %1446 = vmatprep.subr.bf16.mxu1 %v1554_v11  ;;  %1458 = vmatprep.subr.bf16.mxu0 %v1554_v11 }
   0xc   :  { %1322 = vmatprep.mubr.msk.f32.mxu0 %vm45_vm0, %v30_v1 }
   0xd   :  { %1329 = vmatmul.mubr.msk.f32.gmra.mrb[2].mxu1 %vm45_vm0, %v35_v15  ;;  %1460 = vmatpush3.bf16.msra.mxu0 %v1654_v16 }
   0xe   :  { %1448 = vmatpush3.bf16.msra.mxu1 %v1654_v16  ;;  %1339 = vmatprep.mubr.msk.f32.mxu1 %vm1556_vm1, %v1557_v17 }
   0xf   :  { %1449 = vmatprep.subr.bf16.mxu1 %v1554_v11  ;;  %1467 = vmatprep.subr.bf16.mxu0 %v1554_v11 }
  0x10   :  { %1323 = vmatmul.mubr.msk.f32.gmra.mrb[2].mxu0 %vm45_vm0, %v31_v2 }
  0x11   :  { %1340 = vmatmul.mubr.f32.vlgmr.msra.gmra.mrb[4].mxu1 %v1557_v17  ;;  %1361 = vmatprep.mubr.msk.f32.mxu0 %vm1556_vm1, %v1557_v17 }
  0x12   :  { %1451 = vmatpush3.bf16.msra.mxu1 %v1630_v9  ;;  %1350 = vmatprep.mubr.msk.f32.mxu1 %vm1556_vm1, %v1557_v17 }
  0x13   :  { %1452 = vmatprep.subr.bf16.mxu1 %v1554_v11 }
  0x16   :  { %1454 = vmatpush3.bf16.msra.mxu1 %v1654_v16 }
  0x17   :  { %1461 = vmatprep.subr.bf16.mxu1 %v1554_v11 }
  0x78   :  { %v1688_v31 = vpop.permute.xlu0 %276 }
  0xdb   :  { %v1321_v19 = vpop.f32.mrb[0].mxu0 }
  0xdc   :  { %v1327_v20 = vpop.f32.mrb[0].mxu1  ;;  %v142_v21 = vadd.f32 %v1321_v19, %v1676_v18  ;;  %v136_v23 = vpop.f32.mrb[1].mxu0 }
  0xdd   :  { %v162_v22 = vadd.f32 %v1327_v20, %v1676_v18  ;;  %v156_v24 = vpop.f32.mrb[1].mxu1  ;;  %v137_v25 = vadd.f32 %v1676_v18, %v136_v23 }
  0xde   :  { %v157_v26 = vadd.f32 %v1676_v18, %v156_v24  ;;  %177 = vst.msk [vmem:[#allocation2 + $0x8] sm:$0xff] %vm175_vm2, %v142_v21 }
  0xdf   :  { %181 = vst.msk [vmem:[#allocation2 + $0x28] sm:$0xff] %vm175_vm2, %v162_v22  ;;  %176 = vst.msk [vmem:[#allocation2] sm:$0xff] %vm175_vm2, %v137_v25 }
  0xe0   :  { %180 = vst.msk [vmem:[#allocation2 + $0x20] sm:$0xff] %vm175_vm2, %v157_v26  ;;  %v1330_v27 = vpop.f32.mrb[2].mxu1 }
  0xe1   :  { %v172_v28 = vadd.f32 %v1330_v27, %v1676_v18  ;;  %v166_v29 = vpop.f32.mrb[3].mxu1 }
  0xe2   :  { %v167_v30 = vadd.f32 %v1676_v18, %v166_v29 }
  0xe3   :  { %183 = vst.msk [vmem:[#allocation2 + $0x38] sm:$0xff] %vm175_vm2, %v172_v28  ;;  %v1324_v10 = vpop.f32.mrb[2].mxu0 }
  0xe4   :  { %182 = vst.msk [vmem:[#allocation2 + $0x30] sm:$0xff] %vm175_vm2, %v167_v30  ;;  %v260_v32 = vpop.f32.mrb[4].mxu1  ;;  %v152_v12 = vadd.f32 %v1324_v10, %v1676_v18  ;;  %v146_v13 = vpop.f32.mrb[3].mxu0 }
  0xe5   :  { %v279_v33 = vadd.f32 %v1688_v31, %v260_v32  ;;  %v1341_v34 = vpop.f32.mrb[5].mxu1  ;;  %v305_v55 = vld [vmem:[#allocation2 + $0x8] sm:$0xff]  ;;  %v147_v14 = vadd.f32 %v1676_v18, %v146_v13 }
  0xe6   :  { %v189_v35 = vld [vmem:[#allocation2] sm:$0xff]  ;;  %179 = vst.msk [vmem:[#allocation2 + $0x18] sm:$0xff] %vm175_vm2, %v152_v12 }
  0xe7   :  { %281 = vrot.lane.b32.xlu0 %v279_v33, %s1555_s28  ;;  %v264_v36 = vadd.f32 %v260_v32, %v189_v35  ;;  %178 = vst.msk [vmem:[#allocation2 + $0x10] sm:$0xff] %vm175_vm2, %v147_v14 }
  0xe9   :  { %v1228_v37 = vmul.f32 -1.442695, %v264_v36 }
  0xeb   :  { %1506 = vpow2.f32 %v1228_v37 }
  0xee   :  { %v412_v21 = vld [vmem:[#allocation2 + $0x10] sm:$0xff] }
  0xf5   :  { %v1507_v38 = vpop.eup %1506 }
  0xf6   :  { %v268_v39 = vadd.f32 1.0, %v1507_v38 }
  0xf8   :  { %1508 = vrcp.f32 %v268_v39 }
 0x102   :  { %v1509_v40 = vpop.eup %1508 }
 0x103   :  { %v291_v46 = vsub.f32 1.0, %v1509_v40  ;;  %v297_v48 = vmul.f32 0.0, %v1509_v40 }
 0x159   :  { %v282_v41 = vpop.permute.xlu0 %281 }
 0x15a   :  { %v284_v42 = vmul.f32 %v1509_v40, %v282_v41 }
 0x15c   :  { %286 = vrot.lane.b32.xlu1 %v284_v42, %s1555_s28  ;;  %v519_v42 = vld [vmem:[#allocation2 + $0x18] sm:$0xff] }
 0x1ce   :  { %v287_v43 = vpop.permute.xlu1 %286 }
 0x1cf   :  { %v289_v44 = vadd.f32 %v287_v43, %v189_v35 }
 0x1d1   :  { %1510 = vtanh.f32 %v289_v44 }
 0x1db   :  { %v1511_v45 = vpop.eup %1510 }
 0x1dc   :  { %293 = vrot.lane.b32.xlu1 %v1511_v45, %s1558_s3 }
 0x24e   :  { %v294_v47 = vpop.permute.xlu1 %293 }
 0x24f   :  { %v296_v49 = vmul.f32 %v294_v47, %v291_v46 }
 0x251   :  { %v298_v50 = vadd.f32 %v297_v48, %v296_v49 }
 0x253   :  { %300 = vrot.lane.b32.xlu0 %v298_v50, %s1558_s3 }
 0x2c5   :  { %v301_v51 = vpop.permute.xlu0 %300 }
 0x2c6   :  { %303 = vst.msk [vmem:[#allocation3] sm:$0xff] %vm190_vm3, %v301_v51  ;;  %1351 = vmatmul.mubr.msk.f32.vlgmr.msra.gmra.mrb[6].mxu1 %vm190_vm3, %v301_v51 }
 0x2c7   :  { %1463 = vmatpush3.bf16.msra.mxu1 %v1630_v9  ;;  %1372 = vmatprep.mubr.msk.f32.mxu1 %vm1556_vm1, %v1557_v17 }
 0x2c8   :  { %1464 = vmatprep.subr.bf16.mxu1 %v1554_v11 }
 0x2cb   :  { %1466 = vmatpush3.bf16.msra.mxu1 %v1654_v16 }
 0x2cc   :  { %1473 = vmatprep.subr.bf16.mxu1 %v1554_v11 }
 0x399   :  { %v374_v52 = vpop.f32.mrb[6].mxu1 }
 0x39a   :  { %v385_v53 = vadd.f32 %v374_v52, %v1688_v31  ;;  %v1352_v54 = vpop.f32.mrb[7].mxu1  ;;  %v378_v56 = vadd.f32 %v374_v52, %v305_v55 }
 0x39c   :  { %387 = vrot.lane.b32.xlu1 %v385_v53, %s1555_s28  ;;  %v1231_v57 = vmul.f32 -1.442695, %v378_v56 }
 0x39e   :  { %1512 = vpow2.f32 %v1231_v57 }
 0x3a8   :  { %v1513_v58 = vpop.eup %1512 }
 0x3a9   :  { %v382_v59 = vadd.f32 1.0, %v1513_v58 }
 0x3ab   :  { %1514 = vrcp.f32 %v382_v59 }
 0x3b5   :  { %v1515_v60 = vpop.eup %1514 }
 0x3b6   :  { %v397_v4 = vsub.f32 1.0, %v1515_v60  ;;  %v403_v6 = vmul.f32 %v1515_v60, %v298_v50 }
 0x40e   :  { %v388_v61 = vpop.permute.xlu1 %387 }
 0x40f   :  { %v390_v62 = vmul.f32 %v1515_v60, %v388_v61 }
 0x411   :  { %392 = vrot.lane.b32.xlu0 %v390_v62, %s1555_s28  ;;  %v626_v62 = vld [vmem:[#allocation2 + $0x20] sm:$0xff] }
 0x483   :  { %v393_v63 = vpop.permute.xlu0 %392 }
 0x484   :  { %v395_v0 = vadd.f32 %v393_v63, %v305_v55 }
 0x486   :  { %1516 = vtanh.f32 %v395_v0 }
 0x490   :  { %v1517_v3 = vpop.eup %1516 }
 0x491   :  { %399 = vrot.lane.b32.xlu1 %v1517_v3, %s1558_s3 }
 0x503   :  { %v400_v5 = vpop.permute.xlu1 %399 }
 0x504   :  { %v402_v7 = vmul.f32 %v400_v5, %v397_v4 }
 0x506   :  { %v404_v8 = vadd.f32 %v403_v6, %v402_v7 }
 0x508   :  { %406 = vrot.lane.b32.xlu0 %v404_v8, %s1558_s3 }
 0x57a   :  { %v407_v15 = vpop.permute.xlu0 %406 }
 0x57b   :  { %410 = vst.msk [vmem:[#allocation3 + $0x8] sm:$0xff] %vm190_vm3, %v407_v15  ;;  %1362 = vmatmul.mubr.msk.f32.vlgmr.msra.gmra.mrb[4].mxu0 %vm190_vm3, %v407_v15 }
 0x57c   :  { %1469 = vmatpush3.bf16.msra.mxu0 %v1630_v9  ;;  %1383 = vmatprep.mubr.msk.f32.mxu0 %vm1556_vm1, %v1557_v17 }
 0x57d   :  { %1470 = vmatprep.subr.bf16.mxu0 %v1554_v11 }
 0x580   :  { %1472 = vmatpush3.bf16.msra.mxu0 %v1654_v16 }
 0x581   :  { %1479 = vmatprep.subr.bf16.mxu0 %v1554_v11 }
 0x64e   :  { %v481_v18 = vpop.f32.mrb[4].mxu0 }
 0x64f   :  { %v492_v19 = vadd.f32 %v481_v18, %v1688_v31  ;;  %v1363_v20 = vpop.f32.mrb[5].mxu0  ;;  %v485_v22 = vadd.f32 %v481_v18, %v412_v21 }
 0x651   :  { %494 = vrot.lane.b32.xlu1 %v492_v19, %s1555_s28  ;;  %v1233_v23 = vmul.f32 -1.442695, %v485_v22  ;;  %v733_v22 = vld [vmem:[#allocation2 + $0x28] sm:$0xff] }
 0x653   :  { %1518 = vpow2.f32 %v1233_v23 }
 0x65d   :  { %v1519_v24 = vpop.eup %1518 }
 0x65e   :  { %v489_v25 = vadd.f32 1.0, %v1519_v24 }
 0x660   :  { %1520 = vrcp.f32 %v489_v25 }
 0x66a   :  { %v1521_v26 = vpop.eup %1520 }
 0x66b   :  { %v504_v33 = vsub.f32 1.0, %v1521_v26  ;;  %v510_v35 = vmul.f32 %v1521_v26, %v404_v8 }
 0x6c3   :  { %v495_v27 = vpop.permute.xlu1 %494 }
 0x6c4   :  { %v497_v28 = vmul.f32 %v1521_v26, %v495_v27 }
 0x6c6   :  { %499 = vrot.lane.b32.xlu0 %v497_v28, %s1555_s28  ;;  %v1062_v28 = vld [vmem:[%s1867_s5] sm:$0xff] }
 0x738   :  { %v500_v29 = vpop.permute.xlu0 %499 }
 0x739   :  { %v502_v30 = vadd.f32 %v500_v29, %v412_v21  ;;  %v1063_v29 = vld [vmem:[%s1867_s5 + $0x8] sm:$0xff] }
 0x73b   :  { %1522 = vtanh.f32 %v502_v30  ;;  %v1491_v30 = vpack.c.bf16 %v1063_v29, %v1062_v28 }
 0x745   :  { %v1523_v32 = vpop.eup %1522 }
 0x746   :  { %506 = vrot.lane.b32.xlu1 %v1523_v32, %s1558_s3 }
 0x7b8   :  { %v507_v34 = vpop.permute.xlu1 %506 }
 0x7b9   :  { %v509_v36 = vmul.f32 %v507_v34, %v504_v33 }
 0x7bb   :  { %v511_v37 = vadd.f32 %v510_v35, %v509_v36 }
 0x7bd   :  { %513 = vrot.lane.b32.xlu0 %v511_v37, %s1558_s3 }
 0x82f   :  { %v514_v38 = vpop.permute.xlu0 %513 }
 0x830   :  { %517 = vst.msk [vmem:[#allocation3 + $0x10] sm:$0xff] %vm190_vm3, %v514_v38  ;;  %1373 = vmatmul.mubr.msk.f32.vlgmr.msra.gmra.mrb[8].mxu1 %vm190_vm3, %v514_v38  ;;  %v1064_v38 = vld [vmem:[%s1867_s5 + $0x10] sm:$0xff] }
 0x831   :  { %1475 = vmatpush3.bf16.msra.mxu1 %v1630_v9  ;;  %1394 = vmatprep.mubr.msk.f32.mxu1 %vm1556_vm1, %v1557_v17 }
 0x832   :  { %1476 = vmatprep.subr.bf16.mxu1 %v1554_v11 }
 0x835   :  { %1478 = vmatpush3.bf16.msra.mxu1 %v1654_v16 }
 0x836   :  { %1485 = vmatprep.subr.bf16.mxu1 %v1554_v11 }
 0x903   :  { %v588_v39 = vpop.f32.mrb[8].mxu1 }
 0x904   :  { %v599_v40 = vadd.f32 %v588_v39, %v1688_v31  ;;  %v1374_v41 = vpop.f32.mrb[9].mxu1  ;;  %v592_v43 = vadd.f32 %v588_v39, %v519_v42  ;;  %v1065_v39 = vld [vmem:[%s1867_s5 + $0x18] sm:$0xff] }
 0x906   :  { %601 = vrot.lane.b32.xlu1 %v599_v40, %s1555_s28  ;;  %v1235_v44 = vmul.f32 -1.442695, %v592_v43  ;;  %v1495_v40 = vpack.c.bf16 %v1065_v39, %v1064_v38  ;;  %v1055_v43 = vld [vmem:[#allocation3 + $0x8] sm:$0xff] }
 0x908   :  { %1524 = vpow2.f32 %v1235_v44  ;;  %v1056_v44 = vld [vmem:[#allocation3 + $0x10] sm:$0xff] }
 0x912   :  { %v1525_v45 = vpop.eup %1524 }
 0x913   :  { %v596_v46 = vadd.f32 1.0, %v1525_v45 }
 0x915   :  { %1526 = vrcp.f32 %v596_v46 }
 0x91f   :  { %v1527_v47 = vpop.eup %1526 }
 0x920   :  { %v611_v53 = vsub.f32 1.0, %v1527_v47  ;;  %v617_v55 = vmul.f32 %v1527_v47, %v511_v37 }
 0x978   :  { %v602_v48 = vpop.permute.xlu1 %601 }
 0x979   :  { %v604_v49 = vmul.f32 %v1527_v47, %v602_v48 }
 0x97b   :  { %606 = vrot.lane.b32.xlu0 %v604_v49, %s1555_s28 }
 0x9ed   :  { %v607_v50 = vpop.permute.xlu0 %606 }
 0x9ee   :  { %v609_v51 = vadd.f32 %v607_v50, %v519_v42  ;;  %v1054_v42 = vld [vmem:[#allocation3] sm:$0xff] }
 0x9f0   :  { %1528 = vtanh.f32 %v609_v51  ;;  %v1802_v51 = vld [vmem:[%s1868_s6] ss:$0 sm:$0xff] }
 0x9fa   :  { %v1529_v52 = vpop.eup %1528 }
 0x9fb   :  { %613 = vrot.lane.b32.xlu1 %v1529_v52, %s1558_s3 }
 0xa6d   :  { %v614_v54 = vpop.permute.xlu1 %613 }
 0xa6e   :  { %v616_v56 = vmul.f32 %v614_v54, %v611_v53 }
 0xa70   :  { %v618_v57 = vadd.f32 %v617_v55, %v616_v56 }
 0xa72   :  { %620 = vrot.lane.b32.xlu0 %v618_v57, %s1558_s3 }
 0xae4   :  { %v621_v58 = vpop.permute.xlu0 %620 }
 0xae5   :  { %624 = vst.msk [vmem:[#allocation3 + $0x18] sm:$0xff] %vm190_vm3, %v621_v58  ;;  %1384 = vmatmul.mubr.msk.f32.vlgmr.msra.gmra.mrb[6].mxu0 %vm190_vm3, %v621_v58 }
 0xae6   :  { %1481 = vmatpush3.bf16.msra.mxu0 %v1630_v9  ;;  %1405 = vmatprep.mubr.msk.f32.mxu0 %vm1556_vm1, %v1557_v17 }
 0xae7   :  { %1482 = vmatprep.subr.bf16.mxu0 %v1554_v11 }
 0xaea   :  { %1484 = vmatpush3.bf16.msra.mxu0 %v1654_v16 }
 0xaeb   :  { %1492 = vmatprep.subr.bf16.mxu0 %v1491_v30 }
 0xaec   :  { %v1057_v45 = vld [vmem:[#allocation3 + $0x18] sm:$0xff] }
 0xbb8   :  { %v695_v59 = vpop.f32.mrb[6].mxu0 }
 0xbb9   :  { %v706_v60 = vadd.f32 %v695_v59, %v1688_v31  ;;  %v1385_v61 = vpop.f32.mrb[7].mxu0  ;;  %v699_v63 = vadd.f32 %v695_v59, %v626_v62 }
 0xbbb   :  { %708 = vrot.lane.b32.xlu1 %v706_v60, %s1555_s28  ;;  %v1237_v0 = vmul.f32 -1.442695, %v699_v63 }
 0xbbd   :  { %1530 = vpow2.f32 %v1237_v0  ;;  %v840_v0 = vld [vmem:[#allocation2 + $0x30] sm:$0xff] }
 0xbc7   :  { %v1531_v1 = vpop.eup %1530 }
 0xbc8   :  { %v703_v2 = vadd.f32 1.0, %v1531_v1 }
 0xbca   :  { %1532 = vrcp.f32 %v703_v2 }
 0xbd4   :  { %v1533_v3 = vpop.eup %1532 }
 0xbd5   :  { %v718_v10 = vsub.f32 1.0, %v1533_v3  ;;  %v724_v13 = vmul.f32 %v1533_v3, %v618_v57 }
 0xc2d   :  { %v709_v4 = vpop.permute.xlu1 %708 }
 0xc2e   :  { %v711_v5 = vmul.f32 %v1533_v3, %v709_v4 }
 0xc30   :  { %713 = vrot.lane.b32.xlu0 %v711_v5, %s1555_s28 }
 0xca2   :  { %v714_v6 = vpop.permute.xlu0 %713 }
 0xca3   :  { %v716_v7 = vadd.f32 %v714_v6, %v626_v62 }
 0xca5   :  { %1534 = vtanh.f32 %v716_v7 }
 0xcaf   :  { %v1535_v8 = vpop.eup %1534 }
 0xcb0   :  { %720 = vrot.lane.b32.xlu1 %v1535_v8, %s1558_s3 }
 0xd22   :  { %v721_v12 = vpop.permute.xlu1 %720 }
 0xd23   :  { %v723_v14 = vmul.f32 %v721_v12, %v718_v10 }
 0xd25   :  { %v725_v15 = vadd.f32 %v724_v13, %v723_v14 }
 0xd27   :  { %727 = vrot.lane.b32.xlu0 %v725_v15, %s1558_s3 }
 0xd99   :  { %v728_v18 = vpop.permute.xlu0 %727 }
 0xd9a   :  { %731 = vst.msk [vmem:[#allocation3 + $0x20] sm:$0xff] %vm190_vm3, %v728_v18  ;;  %1395 = vmatmul.mubr.msk.f32.vlgmr.msra.gmra.mrb[10].mxu1 %vm190_vm3, %v728_v18 }
 0xd9b   :  { %1487 = vmatpush3.bf16.msra.mxu1 %v1630_v9  ;;  %1416 = vmatprep.mubr.msk.f32.mxu1 %vm1556_vm1, %v1557_v17 }
 0xd9c   :  { %1488 = vmatprep.subr.bf16.mxu1 %v1554_v11 }
 0xd9f   :  { %1490 = vmatpush3.bf16.msra.mxu1 %v1654_v16 }
 0xda1   :  { %v1058_v46 = vld [vmem:[#allocation3 + $0x20] sm:$0xff] }
 0xe6d   :  { %v802_v19 = vpop.f32.mrb[10].mxu1 }
 0xe6e   :  { %v813_v20 = vadd.f32 %v802_v19, %v1688_v31  ;;  %v1396_v21 = vpop.f32.mrb[11].mxu1  ;;  %v806_v23 = vadd.f32 %v802_v19, %v733_v22 }
 0xe70   :  { %815 = vrot.lane.b32.xlu1 %v813_v20, %s1555_s28  ;;  %v1239_v24 = vmul.f32 -1.442695, %v806_v23 }
 0xe72   :  { %1536 = vpow2.f32 %v1239_v24 }
 0xe7c   :  { %v1537_v25 = vpop.eup %1536 }
 0xe7d   :  { %v810_v26 = vadd.f32 1.0, %v1537_v25  ;;  %v947_v25 = vld [vmem:[#allocation2 + $0x38] sm:$0xff] }
 0xe7f   :  { %1538 = vrcp.f32 %v810_v26 }
 0xe89   :  { %v1539_v9 = vpop.eup %1538 }
 0xe8a   :  { %v825_v33 = vsub.f32 1.0, %v1539_v9  ;;  %v831_v35 = vmul.f32 %v1539_v9, %v725_v15 }
 0xee2   :  { %v816_v27 = vpop.permute.xlu1 %815 }
 0xee3   :  { %v818_v17 = vmul.f32 %v1539_v9, %v816_v27 }
 0xee5   :  { %820 = vrot.lane.b32.xlu0 %v818_v17, %s1555_s28 }
 0xf57   :  { %v821_v11 = vpop.permute.xlu0 %820 }
 0xf58   :  { %v823_v16 = vadd.f32 %v821_v11, %v733_v22 }
 0xf5a   :  { %1540 = vtanh.f32 %v823_v16 }
 0xf64   :  { %v1541_v32 = vpop.eup %1540 }
 0xf65   :  { %827 = vrot.lane.b32.xlu1 %v1541_v32, %s1558_s3 }
 0xfd7   :  { %v828_v34 = vpop.permute.xlu1 %827 }
 0xfd8   :  { %v830_v36 = vmul.f32 %v828_v34, %v825_v33 }
 0xfda   :  { %v1779_v37 = vadd.f32 %v831_v35, %v830_v36 }
 0xfdc   :  { %834 = vrot.lane.b32.xlu0 %v1779_v37, %s1558_s3 }
0x104e   :  { %v835_v41 = vpop.permute.xlu0 %834 }
0x104f   :  { %838 = vst.msk [vmem:[#allocation3 + $0x28] sm:$0xff] %vm190_vm3, %v835_v41  ;;  %1406 = vmatmul.mubr.msk.f32.vlgmr.msra.gmra.mrb[8].mxu0 %vm190_vm3, %v835_v41 }
0x1050   :  { %1494 = vmatpush3.bf16.msra.mxu0 %v1491_v30  ;;  %1427 = vmatprep.mubr.msk.f32.mxu0 %vm190_vm3, %v1054_v42 }
0x1051   :  { %1496 = vmatprep.subr.bf16.mxu0 %v1495_v40 }
0x1054   :  { %1498 = vmatpush3.bf16.msra.mxu0 %v1495_v40 }
0x1056   :  { %v1059_v47 = vld [vmem:[#allocation3 + $0x28] sm:$0xff] }
0x1057   :  { %1428 = vmatmul.mubr.msk.f32.vlgmr.msra.gmra.mrb[10].mxu0 %vm190_vm3, %v1055_v43 }
0x1058   :  { %1430 = vmatprep.mubr.msk.f32.mxu0 %vm190_vm3, %v1056_v44 }
0x105b   :  { %1431 = vmatmul.mubr.msk.f32.gmra.mrb[12].mxu0 %vm190_vm3, %v1057_v45 }
0x105c   :  { %1433 = vmatprep.mubr.msk.f32.mxu0 %vm190_vm3, %v1058_v46 }
0x105f   :  { %1434 = vmatmul.mubr.msk.f32.gmra.mrb[14].mxu0 %vm190_vm3, %v1059_v47 }
0x1122   :  { %v909_v48 = vpop.f32.mrb[8].mxu0 }
0x1123   :  { %v920_v49 = vadd.f32 %v909_v48, %v1688_v31  ;;  %v1407_v50 = vpop.f32.mrb[9].mxu0  ;;  %v913_v1 = vadd.f32 %v909_v48, %v840_v0 }
0x1125   :  { %922 = vrot.lane.b32.xlu1 %v920_v49, %s1555_s28  ;;  %v1241_v2 = vmul.f32 -1.442695, %v913_v1 }
0x1127   :  { %1542 = vpow2.f32 %v1241_v2 }
0x112a   :  { %v1429_v52 = vpop.f32.mrb[10].mxu0 }
0x112b   :  { %v1169_v53 = vadd.f32 %v1429_v52, %v1802_v51  ;;  %v1163_v54 = vpop.f32.mrb[11].mxu0 }
0x112c   :  { %v1164_v55 = vadd.f32 %v1802_v51, %v1163_v54 }
0x112d   :  { %1204 = vst.msk [vmem:[%s1869_s7 + $0x8] sm:$0xff] %vm1202_vm4, %v1169_v53 }
0x112e   :  { %1203 = vst.msk [vmem:[%s1869_s7] sm:$0xff] %vm1202_vm4, %v1164_v55  ;;  %v1432_v56 = vpop.f32.mrb[12].mxu0 }
0x112f   :  { %v1179_v57 = vadd.f32 %v1432_v56, %v1802_v51  ;;  %v1173_v58 = vpop.f32.mrb[13].mxu0 }
0x1130   :  { %v1174_v59 = vadd.f32 %v1802_v51, %v1173_v58 }
0x1131   :  { %1206 = vst.msk [vmem:[%s1869_s7 + $0x18] sm:$0xff] %vm1202_vm4, %v1179_v57  ;;  %v1543_v3 = vpop.eup %1542 }
0x1132   :  { %1205 = vst.msk [vmem:[%s1869_s7 + $0x10] sm:$0xff] %vm1202_vm4, %v1174_v59  ;;  %v1435_v60 = vpop.f32.mrb[14].mxu0  ;;  %v917_v4 = vadd.f32 1.0, %v1543_v3 }
0x1133   :  { %v1189_v61 = vadd.f32 %v1435_v60, %v1802_v51  ;;  %v1183_v62 = vpop.f32.mrb[15].mxu0 }
0x1134   :  { %v1184_v63 = vadd.f32 %v1802_v51, %v1183_v62  ;;  %1544 = vrcp.f32 %v917_v4 }
0x1135   :  { %1208 = vst.msk [vmem:[%s1869_s7 + $0x28] sm:$0xff] %vm1202_vm4, %v1189_v61 }
0x1136   :  { %1207 = vst.msk [vmem:[%s1869_s7 + $0x20] sm:$0xff] %vm1202_vm4, %v1184_v63 }
0x113e   :  { %v1545_v5 = vpop.eup %1544 }
0x113f   :  { %v932_v13 = vsub.f32 1.0, %v1545_v5  ;;  %v938_v15 = vmul.f32 %v1545_v5, %v1779_v37 }
0x1197   :  { %v923_v6 = vpop.permute.xlu1 %922 }
0x1198   :  { %v925_v7 = vmul.f32 %v1545_v5, %v923_v6 }
0x119a   :  { %927 = vrot.lane.b32.xlu0 %v925_v7, %s1555_s28 }
0x120c   :  { %v928_v8 = vpop.permute.xlu0 %927 }
0x120d   :  { %v930_v10 = vadd.f32 %v928_v8, %v840_v0 }
0x120f   :  { %1546 = vtanh.f32 %v930_v10 }
0x1219   :  { %v1547_v12 = vpop.eup %1546 }
0x121a   :  { %934 = vrot.lane.b32.xlu1 %v1547_v12, %s1558_s3 }
0x128c   :  { %v935_v14 = vpop.permute.xlu1 %934 }
0x128d   :  { %v937_v18 = vmul.f32 %v935_v14, %v932_v13 }
0x128f   :  { %v939_v19 = vadd.f32 %v938_v15, %v937_v18 }
0x1291   :  { %941 = vrot.lane.b32.xlu0 %v939_v19, %s1558_s3 }
0x1303   :  { %v942_v20 = vpop.permute.xlu0 %941 }
0x1304   :  { %945 = vst.msk [vmem:[#allocation3 + $0x30] sm:$0xff] %vm190_vm3, %v942_v20  ;;  %1417 = vmatmul.mubr.msk.f32.vlgmr.msra.gmra.mrb[12].mxu1 %vm190_vm3, %v942_v20 }
0x130b   :  { %v1060_v21 = vld [vmem:[#allocation3 + $0x30] sm:$0xff] }
0x130c   :  { %1436 = vmatprep.mubr.msk.f32.mxu0 %vm190_vm3, %v1060_v21 }
0x13d7   :  { %v1016_v22 = vpop.f32.mrb[12].mxu1 }
0x13d8   :  { %v1027_v23 = vadd.f32 %v1016_v22, %v1688_v31  ;;  %v1418_v24 = vpop.f32.mrb[13].mxu1  ;;  %v1020_v26 = vadd.f32 %v1016_v22, %v947_v25 }
0x13da   :  { %1029 = vrot.lane.b32.xlu1 %v1027_v23, %s1555_s28  ;;  %v1243_v9 = vmul.f32 -1.442695, %v1020_v26 }
0x13dc   :  { %1548 = vpow2.f32 %v1243_v9 }
0x13e6   :  { %v1549_v27 = vpop.eup %1548 }
0x13e7   :  { %v1024_v17 = vadd.f32 1.0, %v1549_v27 }
0x13e9   :  { %1550 = vrcp.f32 %v1024_v17 }
0x13f3   :  { %v1551_v11 = vpop.eup %1550 }
0x13f4   :  { %v1039_v31 = vsub.f32 1.0, %v1551_v11  ;;  %v1045_v34 = vmul.f32 %v1551_v11, %v939_v19 }
0x144c   :  { %v1030_v16 = vpop.permute.xlu1 %1029 }
0x144d   :  { %v1032_v28 = vmul.f32 %v1551_v11, %v1030_v16 }
0x144f   :  { %1034 = vrot.lane.b32.xlu0 %v1032_v28, %s1555_s28 }
0x14c1   :  { %v1035_v29 = vpop.permute.xlu0 %1034 }
0x14c2   :  { %v1037_v30 = vadd.f32 %v1035_v29, %v947_v25 }
0x14c4   :  { %1552 = vtanh.f32 %v1037_v30 }
0x14ce   :  { %v1553_v32 = vpop.eup %1552 }
0x14cf   :  { %1041 = vrot.lane.b32.xlu1 %v1553_v32, %s1558_s3 }
0x1541   :  { %v1042_v33 = vpop.permute.xlu1 %1041 }
0x1542   :  { %v1044_v35 = vmul.f32 %v1042_v33, %v1039_v31 }
0x1544   :  { %v1046_v36 = vadd.f32 %v1045_v34, %v1044_v35 }
0x1546   :  { %1048 = vrot.lane.b32.xlu0 %v1046_v36, %s1558_s3 }
0x15b8   :  { %v1049_v37 = vpop.permute.xlu0 %1048 }
0x15b9   :  { %1052 = vst.msk [vmem:[#allocation3 + $0x38] sm:$0xff] %vm190_vm3, %v1049_v37  ;;  %1053 = vst.msk [vmem:[%s1870_s8] sm:$0xff] %vm190_vm3, %v1049_v37 }
0x15c0   :  { %v1061_v38 = vld [vmem:[#allocation3 + $0x38] sm:$0xff] }
0x15c1   :  { %1437 = vmatmul.mubr.msk.f32.gmra.mrb[16].mxu0 %vm190_vm3, %v1061_v38 }
0x1694   :  { %v1438_v39 = vpop.f32.mrb[16].mxu0 }
0x1695   :  { %v1199_v40 = vadd.f32 %v1438_v39, %v1802_v51  ;;  %v1193_v41 = vpop.f32.mrb[17].mxu0 }
0x1696   :  { %v1194_v42 = vadd.f32 %v1802_v51, %v1193_v41 }
0x1697   :  { %1210 = vst.msk [vmem:[%s1869_s7 + $0x38] sm:$0xff] %vm1202_vm4, %v1199_v40 }
0x1698   :  { %1209 = vst.msk [vmem:[%s1869_s7 + $0x30] sm:$0xff] %vm1202_vm4, %v1194_v42 }

</bundles_post_ra>
